<compile_context>
chip_gen: v7x
topology: tpu7x:2x2x1
jax: 0.10.0
libtpu: 0.0.40
codegen_flags: <defaults>
</compile_context>

<pallas_src>
import jax
import jax.numpy as jnp
import numpy as np
from jax.experimental import pallas as pl
from jax.experimental.pallas import tpu as pltpu


# --------------------------------------------------------------------------- #
# Kernel
# --------------------------------------------------------------------------- #
def _make_wlp_kernel(num_layers, eps=1e-5):
    """Build the kernel for a static number of layers.

    Kernel args (in order):
      lw_ref:    (L,)         SMEM f32   pre-normalized layer weights (w / sum(w))
      mask_ref:  (TB, TS)     VMEM f32   attention-mask chunk
      hs_ref_l:  (TB, TS, H)  VMEM       one chunk per layer, native dtype
      gamma_ref: (1, H)       VMEM f32   LayerNorm weight
      beta_ref:  (1, H)       VMEM f32   LayerNorm bias
      out_ref:   (TB, H)      VMEM f32   (resident across the s grid axis)
      acc_ref:   (TB, H)      VMEM f32   scratch: layer-weighted masked sum
      msum_ref:  (TB, 1)      VMEM f32   scratch: mask count
    """
    L = num_layers

    def kernel(lw_ref, mask_ref, *rest):
        hs_refs = rest[:L]
        gamma_ref = rest[L]
        beta_ref = rest[L + 1]
        out_ref = rest[L + 2]
        acc_ref = rest[L + 3]
        msum_ref = rest[L + 4]

        s = pl.program_id(1)

        @pl.when(s == 0)
        def _init():
            acc_ref[...] = jnp.zeros_like(acc_ref)
            msum_ref[...] = jnp.zeros_like(msum_ref)

        mask_f32 = mask_ref[...].astype(jnp.float32)            # (TB, TS)
        tb, ts = mask_f32.shape

        # Hoisted ONCE per step (not per layer): mask in the matmul dtype.
        # Mask values are 0/1 so a bf16 cast is exact.
        hs_dtype = hs_refs[0].dtype
        m3 = mask_f32.astype(hs_dtype).reshape(tb, 1, ts)       # (TB, 1, TS)

        # ---- fused layer-weighted sum + masked seq pooling (MXU, f32 acc) --
        acc = acc_ref[...]
        for l in range(L):                                      # L static & small
            hs = hs_refs[l][...]                                # (TB, TS, H)
            part = jnp.einsum("bqs,bsh->bqh", m3, hs,
                              preferred_element_type=jnp.float32)  # (TB, 1, H)
            acc = acc + lw_ref[l] * part[:, 0, :]               # scalar layer weight
        acc_ref[...] = acc
        msum_ref[...] = msum_ref[...] + jnp.sum(mask_f32, axis=-1, keepdims=True)

        # ---- finalize: masked mean + LayerNorm (eps=1e-5, biased variance) --
        @pl.when(s == pl.num_programs(1) - 1)
        def _finalize():
            sum_mask = jnp.maximum(msum_ref[...], 1e-9)         # torch clamp(min=1e-9)
            inv = pl.reciprocal(sum_mask, approx=True)          # EUP slot; per-row scale
            mean_emb = acc_ref[...] * inv                       # (TB, H)
            mu = jnp.mean(mean_emb, axis=-1, keepdims=True)
            var = jnp.mean((mean_emb - mu) ** 2, axis=-1, keepdims=True)
            normed = (mean_emb - mu) * jax.lax.rsqrt(var + eps)
            out_ref[...] = (normed * gamma_ref[...] + beta_ref[...]).astype(out_ref.dtype)

    return kernel


# --------------------------------------------------------------------------- #
# Tiling helpers
# --------------------------------------------------------------------------- #
def _vmem_capacity_bytes():
    """Physical VMEM per TensorCore; conservative fallback (v7x) if unknown."""
    try:
        info = pltpu.get_tpu_info()
        cap = getattr(info, "vmem_capacity_bytes", None)
        if cap:
            return int(cap)
    except Exception:
        pass
    return 64 << 20


def _aligned_seq_chunk(S, max_ts):
    """Largest TS <= max_ts that divides S and is a multiple of 128.

    If nothing 128-aligned fits, fall back to the smallest 128-aligned
    divisor; if S has no 128-aligned divisor at all, use the full S.
    """
    if S <= max_ts:
        return S
    divs = [d for d in range(128, S, 128) if S % d == 0]
    if not divs:
        # TODO(synk): pad S to a multiple of 128 in the wrapper if this
        # full-S fallback ever overflows the VMEM budget.
        return S
    fitting = [d for d in divs if d <= max_ts]
    return max(fitting) if fitting else min(divs)


def _pick_tiles(B, S, H, L, itemsize, budget_bytes):
    """Pick (TB, TS) so the double-buffered hs footprint 2*L*TB*TS*H*itemsize
    fits budget_bytes, with TB 8-aligned (dense output stores) and TS a
    128-aligned divisor of S when the sequence is chunked."""
    tb = B if B <= 8 else 8
    max_ts = max(1, budget_bytes // (2 * L * tb * H * itemsize))
    ts = _aligned_seq_chunk(S, max_ts)
    if ts == S:
        # Whole sequence resident: widen TB with the leftover budget, but keep
        # at least 2 batch blocks so pipelining / megacore sharding stay useful.
        row_bytes = 2 * L * S * H * itemsize
        while tb < B and (2 * tb) * row_bytes <= budget_bytes and pl.cdiv(B, 2 * tb) >= 2:
            tb *= 2
    return int(tb), int(ts)


# --------------------------------------------------------------------------- #
# Wrapper
# --------------------------------------------------------------------------- #
def weighted_layer_pooling(last_hidden_state, hidden_states, attention_mask,
                           layer_weights, ln_gamma, ln_beta, num_hidden_layers,
                           vmem_limit_bytes=None, budget_bytes=None):
    """Pallas implementation of WeightedLayerPooling.forward."""
    del last_hidden_state  # unused, same as the torch forward

    layers = tuple(hidden_states)[-num_hidden_layers:]      # L arrays of (B, S, H)
    L = len(layers)
    B, S, H = layers[0].shape

    lw = layer_weights.astype(jnp.float32)
    lw_norm = lw / jnp.sum(lw)                               # hoist 1/sum(w) out of kernel
    mask = attention_mask.astype(jnp.float32)                # (B, S)
    gamma = ln_gamma.astype(jnp.float32).reshape(1, H)
    beta = ln_beta.astype(jnp.float32).reshape(1, H)

    itemsize = jnp.dtype(layers[0].dtype).itemsize

    # Generation-aware VMEM sizing: scoped limit ~75% of physical, hs budget
    # half of that (v5e/v6e: 96/48 MiB, v7x: 48/24 MiB).
    cap = _vmem_capacity_bytes()
    if vmem_limit_bytes is None:
        vmem_limit_bytes = min((cap * 3) // 4, 100 << 20)
    if budget_bytes is None:
        budget_bytes = vmem_limit_bytes // 2

    TB, TS = _pick_tiles(B, S, H, L, itemsize, budget_bytes)
    grid = (pl.cdiv(B, TB), pl.cdiv(S, TS))

    hs_specs = [pl.BlockSpec((TB, TS, H), lambda b, s: (b, s, 0))
                for _ in range(L)]

    return pl.pallas_call(
        _make_wlp_kernel(L),
        grid=grid,
        in_specs=[
            pl.BlockSpec(memory_space=pltpu.MemorySpace.SMEM),   # normalized layer weights
            pl.BlockSpec((TB, TS), lambda b, s: (b, s)),         # mask chunk
            *hs_specs,                                           # L hidden-state chunks
            pl.BlockSpec((1, H), lambda b, s: (0, 0)),           # gamma
            pl.BlockSpec((1, H), lambda b, s: (0, 0)),           # beta
        ],
        out_specs=pl.BlockSpec((TB, H), lambda b, s: (b, 0)),    # resident across s
        out_shape=jax.ShapeDtypeStruct((B, H), jnp.float32),
        scratch_shapes=[
            pltpu.VMEM((TB, H), jnp.float32),   # layer-weighted masked-sum accumulator
            pltpu.VMEM((TB, 1), jnp.float32),   # mask-count accumulator
        ],
        compiler_params=pltpu.CompilerParams(
            dimension_semantics=("parallel", "arbitrary"),
            vmem_limit_bytes=int(vmem_limit_bytes),
        ),
    )(lw_norm, mask, *layers, gamma, beta)


# --------------------------------------------------------------------------- #
# Pure-JAX reference (mirror of the torch forward)
# --------------------------------------------------------------------------- #
def _reference(hidden_states, attention_mask, layer_weights, gamma, beta,
               num_hidden_layers):
    all_layer_embedding = jnp.stack(hidden_states)[-num_hidden_layers:]
    wf = layer_weights[:, None, None, None]
    weighted_average = (wf * all_layer_embedding).sum(0) / layer_weights.sum()
    m = attention_mask[:, :, None].astype(jnp.float32)
    sum_embeddings = jnp.sum(weighted_average * m, axis=1)
    sum_mask = jnp.maximum(jnp.sum(m, axis=1), 1e-9)
    mean_embeddings = sum_embeddings / sum_mask
    mu = jnp.mean(mean_embeddings, axis=-1, keepdims=True)
    var = jnp.mean((mean_embeddings - mu) ** 2, axis=-1, keepdims=True)
    return (mean_embeddings - mu) * jax.lax.rsqrt(var + 1e-5) * gamma + beta


# --------------------------------------------------------------------------- #
# Tests
# --------------------------------------------------------------------------- #
if __name__ == "__main__":
    # ---- Test 1: small, module-consistent shapes (single grid step) --------
    B, S, H = 2, 8, 128
    num_hidden_layers = 4
    n_total_layers = 5

    key = jax.random.PRNGKey(0)
    keys = jax.random.split(key, n_total_layers + 1)

    hidden_states = tuple(
        jax.random.normal(keys[i], (B, S, H), dtype=jnp.float32)
        for i in range(n_total_layers)
    )
    last_hidden_state = hidden_states[-1]

    attention_mask = (jnp.arange(S)[None, :] <
                      jnp.array([[S], [S - 3]])).astype(jnp.int32)     # (B, S)

    layer_weights = jnp.arange(1, num_hidden_layers + 1, dtype=jnp.float32)
    ln_gamma = jnp.ones((H,), dtype=jnp.float32)
    ln_beta = jnp.zeros((H,), dtype=jnp.float32)

    out = weighted_layer_pooling(last_hidden_state, hidden_states,
                                 attention_mask, layer_weights,
                                 ln_gamma, ln_beta, num_hidden_layers)
    out = jax.block_until_ready(out)

    ref = _reference(hidden_states, attention_mask, layer_weights,
                     ln_gamma, ln_beta, num_hidden_layers)
    np.testing.assert_allclose(np.asarray(out), np.asarray(ref),
                               rtol=1e-4, atol=1e-4)

    # ---- Test 2: forces the sequence-chunked grid (TS < S, multi-step acc) --
    B2, S2, H2 = 8, 256, 128
    L2 = 3
    n_total2 = 4
    keys2 = jax.random.split(jax.random.PRNGKey(0), n_total2)
    hidden_states2 = tuple(
        jax.random.normal(keys2[i], (B2, S2, H2), dtype=jnp.float32)
        for i in range(n_total2)
    )
    lengths = jnp.array([256, 200, 100, 256, 1, 37, 150, 255])[:, None]
    attention_mask2 = (jnp.arange(S2)[None, :] < lengths).astype(jnp.int32)
    layer_weights2 = jnp.arange(1, L2 + 1, dtype=jnp.float32)
    ln_gamma2 = jnp.linspace(0.5, 1.5, H2, dtype=jnp.float32)
    ln_beta2 = jnp.linspace(-0.1, 0.1, H2, dtype=jnp.float32)

    # Tiny budget -> TS=128, grid=(1, 2): exercises the resident accumulator
    # init/finalize path across sequence chunks.
    out2 = weighted_layer_pooling(hidden_states2[-1], hidden_states2,
                                  attention_mask2, layer_weights2,
                                  ln_gamma2, ln_beta2, L2,
                                  budget_bytes=4 << 20)
    out2 = jax.block_until_ready(out2)

    ref2 = _reference(hidden_states2, attention_mask2, layer_weights2,
                      ln_gamma2, ln_beta2, L2)
    np.testing.assert_allclose(np.asarray(out2), np.asarray(ref2),
                               rtol=1e-4, atol=1e-4)

    print("KERNEL_OK")
</pallas_src>

<mosaic_0001>
module attributes {stable_mosaic.version = 11 : i64} {
  func.func @kernel(%arg0: i32, %arg1: i32, %arg2: memref<4xf32, #tpu.memory_space<smem>>, %arg3: memref<2x8xf32, #tpu.memory_space<vmem>>, %arg4: memref<2x8x128xf32, #tpu.memory_space<vmem>>, %arg5: memref<2x8x128xf32, #tpu.memory_space<vmem>>, %arg6: memref<2x8x128xf32, #tpu.memory_space<vmem>>, %arg7: memref<2x8x128xf32, #tpu.memory_space<vmem>>, %arg8: memref<1x128xf32, #tpu.memory_space<vmem>>, %arg9: memref<1x128xf32, #tpu.memory_space<vmem>>, %arg10: memref<2x128xf32, #tpu.memory_space<vmem>>, %arg11: memref<2x128xf32, #tpu.memory_space<vmem>>, %arg12: memref<2x1xf32, #tpu.memory_space<vmem>>) attributes {dimension_semantics = [#tpu.dimension_semantics<parallel>, #tpu.dimension_semantics<arbitrary>], iteration_bounds = array<i64: 1, 1>, scalar_prefetch = 0 : i64, scratch_operands = 2 : i64, tpu.core_type = #tpu.core_type<tc>, window_params = [{transform_indices = @transform_0, window_bounds = array<i64: 4>}, {transform_indices = @transform_1, window_bounds = array<i64: 2, 8>}, {transform_indices = @transform_2, window_bounds = array<i64: 2, 8, 128>}, {transform_indices = @transform_3, window_bounds = array<i64: 2, 8, 128>}, {transform_indices = @transform_4, window_bounds = array<i64: 2, 8, 128>}, {transform_indices = @transform_5, window_bounds = array<i64: 2, 8, 128>}, {pipeline_mode = #tpu.pipeline_mode<synchronous>, transform_indices = @transform_6, window_bounds = array<i64: 1, 128>}, {pipeline_mode = #tpu.pipeline_mode<synchronous>, transform_indices = @transform_7, window_bounds = array<i64: 1, 128>}, {transform_indices = @transform_8, window_bounds = array<i64: 2, 128>}]} {
    %c0_i32 = arith.constant 0 : i32
    %0 = arith.cmpi eq, %arg1, %c0_i32 : i32
    %1 = arith.extui %0 : i1 to i32
    %c0_i32_0 = arith.constant 0 : i32
    %2 = arith.cmpi ne, %1, %c0_i32_0 : i32
    scf.if %2 {
      %cst_29 = arith.constant 0.000000e+00 : f32
      %43 = vector.broadcast %cst_29 : f32 to vector<2x128xf32>
      %c0_30 = arith.constant 0 : index
      %c0_31 = arith.constant 0 : index
      %44 = vector.load %arg11[%c0_30, %c0_31] : memref<2x128xf32, #tpu.memory_space<vmem>>, vector<2x128xf32>
      tpu.vector_store %arg11[%c0_30, %c0_31], %43 {strides = array<i32>} : memref<2x128xf32, #tpu.memory_space<vmem>>, vector<2x128xf32>,
      %cst_32 = arith.constant 0.000000e+00 : f32
      %45 = vector.broadcast %cst_32 : f32 to vector<2x1xf32>
      %c0_33 = arith.constant 0 : index
      %c0_34 = arith.constant 0 : index
      %46 = vector.load %arg12[%c0_33, %c0_34] : memref<2x1xf32, #tpu.memory_space<vmem>>, vector<2x1xf32>
      tpu.vector_store %arg12[%c0_33, %c0_34], %45 {strides = array<i32>} : memref<2x1xf32, #tpu.memory_space<vmem>>, vector<2x1xf32>,
    } else {
    }
    %c0 = arith.constant 0 : index
    %c0_1 = arith.constant 0 : index
    %3 = vector.load %arg3[%c0, %c0_1] : memref<2x8xf32, #tpu.memory_space<vmem>>, vector<2x8xf32>
    %4 = vector.shape_cast %3 : vector<2x8xf32> to vector<2x1x8xf32>
    %c0_2 = arith.constant 0 : index
    %c0_3 = arith.constant 0 : index
    %5 = vector.load %arg11[%c0_2, %c0_3] : memref<2x128xf32, #tpu.memory_space<vmem>>, vector<2x128xf32>
    %c0_4 = arith.constant 0 : index
    %c0_5 = arith.constant 0 : index
    %c0_6 = arith.constant 0 : index
    %6 = vector.load %arg4[%c0_4, %c0_5, %c0_6] : memref<2x8x128xf32, #tpu.memory_space<vmem>>, vector<2x8x128xf32>
    "tpu.trace_start"() <{level = 10 : i32, message = "bqs,bsh->bqh"}> : () -> ()
    %cst = arith.constant dense<0.000000e+00> : vector<2x1x128xf32>
    %7 = tpu.matmul %4, %6, %cst {dimension_numbers = #tpu.dot_dimension_numbers<[2], [1], [1], [2], [0, 0, 0, 1, 1, 2], [0], [0]>} : vector<2x1x8xf32>, vector<2x8x128xf32>, vector<2x1x128xf32> -> vector<2x1x128xf32>
    "tpu.trace_stop"() : () -> ()
    %c0_7 = arith.constant 0 : index
    %8 = memref.load %arg2[%c0_7] : memref<4xf32, #tpu.memory_space<smem>>
    %9 = vector.shape_cast %7 : vector<2x1x128xf32> to vector<2x128xf32>
    %10 = vector.broadcast %8 : f32 to vector<2x128xf32>
    %11 = arith.mulf %10, %9 : vector<2x128xf32>
    %12 = arith.addf %5, %11 : vector<2x128xf32>
    %c0_8 = arith.constant 0 : index
    %c0_9 = arith.constant 0 : index
    %c0_10 = arith.constant 0 : index
    %13 = vector.load %arg5[%c0_8, %c0_9, %c0_10] : memref<2x8x128xf32, #tpu.memory_space<vmem>>, vector<2x8x128xf32>
    "tpu.trace_start"() <{level = 10 : i32, message = "bqs,bsh->bqh"}> : () -> ()
    %cst_11 = arith.constant dense<0.000000e+00> : vector<2x1x128xf32>
    %14 = tpu.matmul %4, %13, %cst_11 {dimension_numbers = #tpu.dot_dimension_numbers<[2], [1], [1], [2], [0, 0, 0, 1, 1, 2], [0], [0]>} : vector<2x1x8xf32>, vector<2x8x128xf32>, vector<2x1x128xf32> -> vector<2x1x128xf32>
    "tpu.trace_stop"() : () -> ()
    %c1 = arith.constant 1 : index
    %15 = memref.load %arg2[%c1] : memref<4xf32, #tpu.memory_space<smem>>
    %16 = vector.shape_cast %14 : vector<2x1x128xf32> to vector<2x128xf32>
    %17 = vector.broadcast %15 : f32 to vector<2x128xf32>
    %18 = arith.mulf %17, %16 : vector<2x128xf32>
    %19 = arith.addf %12, %18 : vector<2x128xf32>
    %c0_12 = arith.constant 0 : index
    %c0_13 = arith.constant 0 : index
    %c0_14 = arith.constant 0 : index
    %20 = vector.load %arg6[%c0_12, %c0_13, %c0_14] : memref<2x8x128xf32, #tpu.memory_space<vmem>>, vector<2x8x128xf32>
    "tpu.trace_start"() <{level = 10 : i32, message = "bqs,bsh->bqh"}> : () -> ()
    %cst_15 = arith.constant dense<0.000000e+00> : vector<2x1x128xf32>
    %21 = tpu.matmul %4, %20, %cst_15 {dimension_numbers = #tpu.dot_dimension_numbers<[2], [1], [1], [2], [0, 0, 0, 1, 1, 2], [0], [0]>} : vector<2x1x8xf32>, vector<2x8x128xf32>, vector<2x1x128xf32> -> vector<2x1x128xf32>
    "tpu.trace_stop"() : () -> ()
    %c2 = arith.constant 2 : index
    %22 = memref.load %arg2[%c2] : memref<4xf32, #tpu.memory_space<smem>>
    %23 = vector.shape_cast %21 : vector<2x1x128xf32> to vector<2x128xf32>
    %24 = vector.broadcast %22 : f32 to vector<2x128xf32>
    %25 = arith.mulf %24, %23 : vector<2x128xf32>
    %26 = arith.addf %19, %25 : vector<2x128xf32>
    %c0_16 = arith.constant 0 : index
    %c0_17 = arith.constant 0 : index
    %c0_18 = arith.constant 0 : index
    %27 = vector.load %arg7[%c0_16, %c0_17, %c0_18] : memref<2x8x128xf32, #tpu.memory_space<vmem>>, vector<2x8x128xf32>
    "tpu.trace_start"() <{level = 10 : i32, message = "bqs,bsh->bqh"}> : () -> ()
    %cst_19 = arith.constant dense<0.000000e+00> : vector<2x1x128xf32>
    %28 = tpu.matmul %4, %27, %cst_19 {dimension_numbers = #tpu.dot_dimension_numbers<[2], [1], [1], [2], [0, 0, 0, 1, 1, 2], [0], [0]>} : vector<2x1x8xf32>, vector<2x8x128xf32>, vector<2x1x128xf32> -> vector<2x1x128xf32>
    "tpu.trace_stop"() : () -> ()
    %c3 = arith.constant 3 : index
    %29 = memref.load %arg2[%c3] : memref<4xf32, #tpu.memory_space<smem>>
    %30 = vector.shape_cast %28 : vector<2x1x128xf32> to vector<2x128xf32>
    %31 = vector.broadcast %29 : f32 to vector<2x128xf32>
    %32 = arith.mulf %31, %30 : vector<2x128xf32>
    %33 = arith.addf %26, %32 : vector<2x128xf32>
    %c0_20 = arith.constant 0 : index
    %c0_21 = arith.constant 0 : index
    %34 = vector.load %arg11[%c0_20, %c0_21] : memref<2x128xf32, #tpu.memory_space<vmem>>, vector<2x128xf32>
    tpu.vector_store %arg11[%c0_20, %c0_21], %33 {strides = array<i32>} : memref<2x128xf32, #tpu.memory_space<vmem>>, vector<2x128xf32>,
    %c0_22 = arith.constant 0 : index
    %c0_23 = arith.constant 0 : index
    %35 = vector.load %arg12[%c0_22, %c0_23] : memref<2x1xf32, #tpu.memory_space<vmem>>, vector<2x1xf32>
    %cst_24 = arith.constant dense<0.000000e+00> : vector<2xf32>
    %36 = vector.multi_reduction <add>, %3, %cst_24 [1] : vector<2x8xf32> to vector<2xf32>
    %37 = vector.shape_cast %36 : vector<2xf32> to vector<2x1xf32>
    %38 = arith.addf %35, %37 : vector<2x1xf32>
    %c0_25 = arith.constant 0 : index
    %c0_26 = arith.constant 0 : index
    %39 = vector.load %arg12[%c0_25, %c0_26] : memref<2x1xf32, #tpu.memory_space<vmem>>, vector<2x1xf32>
    tpu.vector_store %arg12[%c0_25, %c0_26], %38 {strides = array<i32>} : memref<2x1xf32, #tpu.memory_space<vmem>>, vector<2x1xf32>,
    %c0_i32_27 = arith.constant 0 : i32
    %40 = arith.cmpi eq, %arg1, %c0_i32_27 : i32
    %41 = arith.extui %40 : i1 to i32
    %c0_i32_28 = arith.constant 0 : i32
    %42 = arith.cmpi ne, %41, %c0_i32_28 : i32
    scf.if %42 {
      %c0_29 = arith.constant 0 : index
      %c0_30 = arith.constant 0 : index
      %43 = vector.load %arg12[%c0_29, %c0_30] : memref<2x1xf32, #tpu.memory_space<vmem>>, vector<2x1xf32>
      %cst_31 = arith.constant 9.99999971E-10 : f32
      %44 = vector.broadcast %cst_31 : f32 to vector<2x1xf32>
      %45 = arith.maximumf %43, %44 : vector<2x1xf32>
      %46 = tpu.reciprocal %45 {approx = true} : vector<2x1xf32> -> vector<2x1xf32>
      %c0_32 = arith.constant 0 : index
      %c0_33 = arith.constant 0 : index
      %47 = vector.load %arg11[%c0_32, %c0_33] : memref<2x128xf32, #tpu.memory_space<vmem>>, vector<2x128xf32>
      %48 = vector.broadcast %46 : vector<2x1xf32> to vector<2x128xf32>
      %49 = arith.mulf %47, %48 : vector<2x128xf32>
      %cst_34 = arith.constant dense<0.000000e+00> : vector<2xf32>
      %50 = vector.multi_reduction <add>, %49, %cst_34 [1] : vector<2x128xf32> to vector<2xf32>
      %51 = vector.shape_cast %50 : vector<2xf32> to vector<2x1xf32>
      %cst_35 = arith.constant 1.280000e+02 : f32
      %52 = vector.broadcast %cst_35 : f32 to vector<2x1xf32>
      %53 = arith.divf %51, %52 : vector<2x1xf32>
      %54 = vector.broadcast %53 : vector<2x1xf32> to vector<2x128xf32>
      %55 = arith.subf %49, %54 : vector<2x128xf32>
      %56 = arith.mulf %55, %55 : vector<2x128xf32>
      %cst_36 = arith.constant dense<0.000000e+00> : vector<2xf32>
      %57 = vector.multi_reduction <add>, %56, %cst_36 [1] : vector<2x128xf32> to vector<2xf32>
      %58 = vector.shape_cast %57 : vector<2xf32> to vector<2x1xf32>
      %cst_37 = arith.constant 1.280000e+02 : f32
      %59 = vector.broadcast %cst_37 : f32 to vector<2x1xf32>
      %60 = arith.divf %58, %59 : vector<2x1xf32>
      %61 = vector.broadcast %53 : vector<2x1xf32> to vector<2x128xf32>
      %62 = arith.subf %49, %61 : vector<2x128xf32>
      %cst_38 = arith.constant 9.99999974E-6 : f32
      %63 = vector.broadcast %cst_38 : f32 to vector<2x1xf32>
      %64 = arith.addf %60, %63 : vector<2x1xf32>
      %65 = math.rsqrt %64 : vector<2x1xf32>
      %66 = vector.broadcast %65 : vector<2x1xf32> to vector<2x128xf32>
      %67 = arith.mulf %62, %66 : vector<2x128xf32>
      %c0_39 = arith.constant 0 : index
      %c0_40 = arith.constant 0 : index
      %68 = vector.load %arg8[%c0_39, %c0_40] : memref<1x128xf32, #tpu.memory_space<vmem>>, vector<1x128xf32>
      %69 = vector.broadcast %68 : vector<1x128xf32> to vector<2x128xf32>
      %70 = arith.mulf %67, %69 : vector<2x128xf32>
      %c0_41 = arith.constant 0 : index
      %c0_42 = arith.constant 0 : index
      %71 = vector.load %arg9[%c0_41, %c0_42] : memref<1x128xf32, #tpu.memory_space<vmem>>, vector<1x128xf32>
      %72 = vector.broadcast %71 : vector<1x128xf32> to vector<2x128xf32>
      %73 = arith.addf %70, %72 : vector<2x128xf32>
      %c0_43 = arith.constant 0 : index
      %c0_44 = arith.constant 0 : index
      %74 = vector.load %arg10[%c0_43, %c0_44] : memref<2x128xf32, #tpu.memory_space<vmem>>, vector<2x128xf32>
      tpu.vector_store %arg10[%c0_43, %c0_44], %73 {strides = array<i32>} : memref<2x128xf32, #tpu.memory_space<vmem>>, vector<2x128xf32>,
    } else {
    }
    return
  }
  func.func @transform_0(%arg0: i32, %arg1: i32) -> i32 {
    %c0_i32 = arith.constant 0 : i32
    %c0_i32_0 = arith.constant 0 : i32
    return %c0_i32 : i32
  }
  func.func @transform_1(%arg0: i32, %arg1: i32) -> (i32, i32) {
    %c0_i32 = arith.constant 0 : i32
    return %arg0, %arg1 : i32, i32
  }
  func.func @transform_2(%arg0: i32, %arg1: i32) -> (i32, i32, i32) {
    %c0_i32 = arith.constant 0 : i32
    %c0_i32_0 = arith.constant 0 : i32
    return %arg0, %arg1, %c0_i32 : i32, i32, i32
  }
  func.func @transform_3(%arg0: i32, %arg1: i32) -> (i32, i32, i32) {
    %c0_i32 = arith.constant 0 : i32
    %c0_i32_0 = arith.constant 0 : i32
    return %arg0, %arg1, %c0_i32 : i32, i32, i32
  }
  func.func @transform_4(%arg0: i32, %arg1: i32) -> (i32, i32, i32) {
    %c0_i32 = arith.constant 0 : i32
    %c0_i32_0 = arith.constant 0 : i32
    return %arg0, %arg1, %c0_i32 : i32, i32, i32
  }
  func.func @transform_5(%arg0: i32, %arg1: i32) -> (i32, i32, i32) {
    %c0_i32 = arith.constant 0 : i32
    %c0_i32_0 = arith.constant 0 : i32
    return %arg0, %arg1, %c0_i32 : i32, i32, i32
  }
  func.func @transform_6(%arg0: i32, %arg1: i32) -> (i32, i32) {
    %c0_i32 = arith.constant 0 : i32
    %c0_i32_0 = arith.constant 0 : i32
    %c0_i32_1 = arith.constant 0 : i32
    return %c0_i32, %c0_i32_0 : i32, i32
  }
  func.func @transform_7(%arg0: i32, %arg1: i32) -> (i32, i32) {
    %c0_i32 = arith.constant 0 : i32
    %c0_i32_0 = arith.constant 0 : i32
    %c0_i32_1 = arith.constant 0 : i32
    return %c0_i32, %c0_i32_0 : i32, i32
  }
  func.func @transform_8(%arg0: i32, %arg1: i32) -> (i32, i32) {
    %c0_i32 = arith.constant 0 : i32
    %c0_i32_0 = arith.constant 0 : i32
    return %arg0, %c0_i32 : i32, i32
  }
}

</mosaic_0001>

<bundles_post_ra>
// kernel: tpu_custom_call.1
= control target key start
LH: loop header
LB: loop body
LE: loop exit
PB: predicated region body
PF: predicated region fallthrough
CT: control target
= control target key end

     0   :  { %13 = vsyncpa [#allocation7], 0  ;;  %s1152_s0 = inlined_call_operand.hbm [shape: f32[4], index: 0, kind: input, shape index: {}]   ;;  %s1153_s1 = inlined_call_operand.vmem [shape: f32[2,8], index: 1, kind: input, shape index: {}]   ;;  %s1154_s2 = inlined_call_operand.hbm [shape: f32[2,8,128], index: 2, kind: input, shape index: {}]   ;;  %s1155_s3 = inlined_call_operand.hbm [shape: f32[2,8,128], index: 3, kind: input, shape index: {}]   ;;  %s1156_s4 = inlined_call_operand.hbm [shape: f32[2,8,128], index: 4, kind: input, shape index: {}]   ;;  %s1157_s5 = inlined_call_operand.vmem [shape: f32[2,8,128], index: 5, kind: input, shape index: {}]   ;;  %s1158_s6 = inlined_call_operand.vmem [shape: f32[1,128], index: 6, kind: input, shape index: {}]   ;;  %s1159_s7 = inlined_call_operand.vmem [shape: f32[1,128], index: 7, kind: input, shape index: {}]   ;;  %s1160_s8 = inlined_call_operand.hbm [shape: f32[2,128], index: 8, kind: output, shape index: {}]  }
   0x1   :  { %14 = vsyncpa [#allocation5], 0 }
   0x2   :  { %15 = vsyncpa [#allocation10], 0 }
   0x3   :  { %16 = vsyncpa [#allocation6], 0  ;;  %s990_s27 = smov [#allocation9]   ;;  %s991_s29 = smov [#allocation8]  }
   0x4   :  { %s44_s28 = sshll.u32 %s990_s27, 4  ;;  %s32_s30 = sshll.u32 %s991_s29, 4  ;;  %s45_s28 = int_to_ptr.vmem [resolvable:$true] %s44_s28  ;;  %s33_s30 = int_to_ptr.vmem [resolvable:$true] %s32_s30 }
   0x5   :  { %s884_s11 = scalar_lea.hbm %s1155_s3, 256 }
   0x6   :  { %p885_p0 = scmp.ne.s32.totalorder %s1155_s3, %s884_s11  ;;  %p888_p1 = scmp.lt.u32.totalorder %s884_s11, %s1155_s3 }
   0x8   :  { %p890_p2 = pnand %p888_p1, %p885_p0 }
   0xa   :  { %893 = shalt.err (!%p890_p2)
}
   0xb   :  { %s894_s16 = scalar_lea.vmem %s45_s28, 256  ;;  %p899_p4 = scmp.lt.s32.totalorder %s45_s28, %s45_s28 }
   0xc   :  { %p895_p3 = scmp.ne.s32.totalorder %s45_s28, %s894_s16  ;;  %p900_p5 = scmp.lt.s32.totalorder %s894_s16, %s894_s16 }
   0xe   :  { %p901_p6 = por %p900_p5, %p899_p4 }
  0x10   :  { %p902_p7 = pnand %p901_p6, %p895_p3 }
  0x12   :  { %905 = shalt.err (!%p902_p7)
}
  0x13   :  { %s992_s17 = smov 128   ;;  %s993_s18 = smov 8  }
  0x14   :  { %50 = dma.hbm_to_vmem [thread:$0]  %s1155_s3, 256, %s45_s28, [#allocation10], %s992_s17, %s992_s17, %s993_s18  }
  0x15   :  { %s906_s23 = scalar_lea.hbm %s1152_s0, 16 }
  0x16   :  { %p907_p8 = scmp.ne.s32.totalorder %s1152_s0, %s906_s23  ;;  %p910_p9 = scmp.lt.u32.totalorder %s906_s23, %s1152_s0 }
  0x18   :  { %p912_p10 = pnand %p910_p9, %p907_p8 }
  0x1a   :  { %915 = shalt.err (!%p912_p10)
}
  0x1b   :  { %s994_s29 = smov [#allocation4]   ;;  %s916_s11 = scalar_lea.hbm %s1154_s2, 256 }
  0x1c   :  { %24 = dma.hbm_to_smem %s1152_s0, 16, %s994_s29, [#allocation7]  }
  0x1d   :  { %p917_p11 = scmp.ne.s32.totalorder %s1154_s2, %s916_s11  ;;  %p920_p12 = scmp.lt.u32.totalorder %s916_s11, %s1154_s2 }
  0x1f   :  { %p922_p13 = pnand %p920_p12, %p917_p11 }
  0x21   :  { %925 = shalt.err (!%p922_p13)
}
  0x22   :  { %s926_s16 = scalar_lea.vmem %s33_s30, 256  ;;  %p931_p1 = scmp.lt.s32.totalorder %s33_s30, %s33_s30 }
  0x23   :  { %p927_p0 = scmp.ne.s32.totalorder %s33_s30, %s926_s16  ;;  %p932_p2 = scmp.lt.s32.totalorder %s926_s16, %s926_s16 }
  0x25   :  { %p933_p3 = por %p932_p2, %p931_p1 }
  0x27   :  { %p934_p4 = pnand %p933_p3, %p927_p0 }
  0x29   :  { %937 = shalt.err (!%p934_p4)
}
  0x2a   :  { %38 = dma.hbm_to_vmem [thread:$0]  %s1154_s2, 256, %s33_s30, [#allocation5], %s992_s17, %s992_s17, %s993_s18  }
  0x2b   :  { %s995_s20 = smov [#allocation11]   ;;  %s938_s24 = scalar_lea.hbm %s1156_s4, 256 }
  0x2c   :  { %s56_s21 = sshll.u32 %s995_s20, 4  ;;  %p939_p5 = scmp.ne.s32.totalorder %s1156_s4, %s938_s24  ;;  %s57_s21 = int_to_ptr.vmem [resolvable:$true] %s56_s21 }
  0x2d   :  { %p942_p6 = scmp.lt.u32.totalorder %s938_s24, %s1156_s4 }
  0x2f   :  { %p944_p7 = pnand %p942_p6, %p939_p5 }
  0x31   :  { %947 = shalt.err (!%p944_p7)
}
  0x32   :  { %s948_s9 = scalar_lea.vmem %s57_s21, 256  ;;  %p953_p9 = scmp.lt.s32.totalorder %s57_s21, %s57_s21 }
  0x33   :  { %p949_p8 = scmp.ne.s32.totalorder %s57_s21, %s948_s9  ;;  %p954_p10 = scmp.lt.s32.totalorder %s948_s9, %s948_s9 }
  0x35   :  { %p955_p11 = por %p954_p10, %p953_p9 }
  0x37   :  { %p956_p12 = pnand %p955_p11, %p949_p8 }
  0x39   :  { %959 = shalt.err (!%p956_p12)
}
  0x3a   :  { %62 = dma.hbm_to_vmem [thread:$0]  %s1156_s4, 256, %s57_s21, [#allocation10], %s992_s17, %s992_s17, %s993_s18  }
  0x3b   :  { %982 = dma.done.wait [#allocation7], 16  }
  0x3c   :  { %983 = vsyncadd [#allocation7], 4294967280 }
  0x3d   :  { %984 = dma.done.wait [#allocation5], 256  }
  0x3e   :  { %985 = vsyncadd [#allocation5], 4294967040 }
  0x3f   :  { %986 = dma.done.wait [#allocation10], 512  }
  0x40   :  { %987 = vsyncadd [#allocation10], 4294966784 }
  0x41   :  { %81 = sfence }
  0x42   :  { %v89_v0 = vld [vmem:[%s1153_s1] sm:$0x3]  ;;  %v94_v1 = vlaneseq  ;;  %vm730_vm0 = vcmask 58368   ;;  %v996_v2 = vmov 1966171168   ;;  %v997_v5 = vmov 0.0  }
  0x43   :  { %v92_v3 = vunpack.c.l.s4 %v996_v2  ;;  %v731_v4 = vsel %vm730_vm0, %v89_v0, 0.0  ;;  %833 = vmatprep.subr.mxu1 %v997_v5  ;;  %86 = vst [vmem:[#allocation2] sm:$0x3] %v997_v5  ;;  %v115_v6 = vld [vmem:[#allocation8 + $0x8] sm:$0xff]  ;;  %828 = vmatprep.subr.mxu0 %v997_v5  ;;  %v114_v7 = vld [vmem:[#allocation8] sm:$0xff]  ;;  %vm998_vm1 = vmmov 0  }
  0x44   :  { %v95_v8 = vshrl.u32 %v94_v1, 7  ;;  %732 = vadd.xlane.f32.xlu0 %v731_v4  ;;  %834 = vmatpush3.msra.mxu1 %v115_v6  ;;  %vm87_vm2 = vcmask 1024   ;;  %v272_v14 = vld [vmem:[#allocation9] sm:$0xff]  ;;  %vm116_vm3 = vcmask 64512   ;;  %v273_v16 = vld [vmem:[#allocation9 + $0x8] sm:$0xff]  ;;  %v424_v17 = vld [vmem:[#allocation11] sm:$0xff] }
  0x45   :  { %v93_v9 = vunpack.c.0.s8 %v92_v3  ;;  %835 = vmatprep.mubr.msk.f32.mxu1 %vm998_vm1, %v997_v5  ;;  %829 = vmatpush3.msra.mxu0 %v114_v7  ;;  %88 = vst.msk [vmem:[#allocation3] sm:$0x3] %vm87_vm2, %v997_v5  ;;  %v425_v18 = vld [vmem:[#allocation11 + $0x8] sm:$0xff]  ;;  %v999_v21 = vmov 0   ;;  %s803_s28 = sld [smem:[#allocation4 + $0x1]]  ;;  %s806_s11 = sld [smem:[#allocation4 + $0x2]] }
  0x46   :  { %830 = vmatprep.mubr.msk.f32.mxu0 %vm998_vm1, %v997_v5  ;;  %843 = vmatprep.subr.mxu1 %v997_v5  ;;  %v576_v19 = vld [vmem:[%s1157_s5] sm:$0xff]  ;;  %v577_v20 = vld [vmem:[%s1157_s5 + $0x8] sm:$0xff]  ;;  %s261_s5 = sld [smem:[#allocation4]]  ;;  %vm268_vm4 = vcmask 1041409   ;;  %s809_s12 = sld [smem:[#allocation4 + $0x3]]  ;;  %vm750_vm5 = vcmask 1041408  }
  0x47   :  { %v96_v10 = vsub.s32 %v93_v9, %v95_v8  ;;  %838 = vmatprep.subr.mxu0 %v997_v5  ;;  %879 = vset.pattern.permute.xlu0 %v999_v21  ;;  %s1000_s0 = smov [#allocation12]  }
  0x48   :  { %s788_s19 = sshll.u32 %s1000_s0, 4  ;;  %s789_s19 = int_to_ptr.vmem [resolvable:$true] %s788_s19 }
  0x49   :  { %v97_v11 = vrot.slane %v89_v0, %v96_v10  ;;  %s960_s20 = scalar_lea.vmem %s789_s19, 32  ;;  %p965_p0 = scmp.lt.s32.totalorder %s789_s19, %s789_s19 }
  0x4a   :  { %v113_v38 = vld [vmem:[#allocation2] sm:$0x3]  ;;  %p961_p13 = scmp.ne.s32.totalorder %s789_s19, %s960_s20  ;;  %p966_p1 = scmp.lt.s32.totalorder %s960_s20, %s960_s20 }
  0x4b   :  { %v98_v12 = vcombine.high %v97_v11, %v97_v11  ;;  %v105_v13 = vrot.slane %v97_v11, %v96_v10  ;;  %v415_v35 = vstv %s803_s28  ;;  %v567_v46 = vstv %s806_s11 }
  0x4c   :  { %v729_v22 = vld [vmem:[#allocation3] sm:$0x3]  ;;  %v262_v28 = vstv %s261_s5  ;;  %v719_v56 = vstv %s809_s12  ;;  %p967_p2 = por %p966_p1, %p965_p0 }
  0x4d   :  { %v112_v15 = vrot.slane %v98_v12, %v96_v10  ;;  %831 = vmatmul.mubr.msk.f32.vlgmr.msra.gmra.mrb[0].mxu0 %vm116_vm3, %v105_v13 }
  0x4e   :  { %839 = vmatpush3.msra.mxu0 %v272_v14  ;;  %840 = vmatprep.mubr.msk.f32.mxu0 %vm998_vm1, %v997_v5  ;;  %p968_p3 = pnand %p967_p2, %p961_p13 }
  0x4f   :  { %836 = vmatmul.mubr.msk.f32.vlgmr.msra.gmra.mrb[0].mxu1 %vm116_vm3, %v112_v15  ;;  %848 = vmatprep.subr.mxu0 %v997_v5 }
  0x50   :  { %844 = vmatpush3.msra.mxu1 %v273_v16  ;;  %845 = vmatprep.mubr.msk.f32.mxu1 %vm998_vm1, %v997_v5 }
  0x51   :  { %841 = vmatmul.mubr.msk.f32.vlgmr.msra.gmra.mrb[2].mxu0 %vm116_vm3, %v105_v13  ;;  %853 = vmatprep.subr.mxu1 %v997_v5 }
  0x52   :  { %849 = vmatpush3.msra.mxu0 %v424_v17  ;;  %850 = vmatprep.mubr.msk.f32.mxu0 %vm998_vm1, %v997_v5 }
  0x53   :  { %846 = vmatmul.mubr.msk.f32.vlgmr.msra.gmra.mrb[2].mxu1 %vm116_vm3, %v112_v15  ;;  %858 = vmatprep.subr.mxu0 %v997_v5 }
  0x54   :  { %854 = vmatpush3.msra.mxu1 %v425_v18  ;;  %855 = vmatprep.mubr.msk.f32.mxu1 %vm998_vm1, %v997_v5  ;;  %v810_v18 = vld [vmem:[%s1158_s6] ss:$0 sm:$0xff] }
  0x55   :  { %851 = vmatmul.mubr.msk.f32.vlgmr.msra.gmra.mrb[4].mxu0 %vm116_vm3, %v105_v13  ;;  %863 = vmatprep.subr.mxu1 %v997_v5 }
  0x56   :  { %859 = vmatpush3.msra.mxu0 %v576_v19  ;;  %860 = vmatprep.mubr.msk.f32.mxu0 %vm998_vm1, %v997_v5 }
  0x57   :  { %856 = vmatmul.mubr.msk.f32.vlgmr.msra.gmra.mrb[4].mxu1 %vm116_vm3, %v112_v15 }
  0x58   :  { %864 = vmatpush3.msra.mxu1 %v577_v20  ;;  %865 = vmatprep.mubr.msk.f32.mxu1 %vm998_vm1, %v997_v5  ;;  %v811_v20 = vld [vmem:[%s1159_s7] ss:$0 sm:$0xff] }
  0x59   :  { %861 = vmatmul.mubr.msk.f32.vlgmr.msra.gmra.mrb[6].mxu0 %vm116_vm3, %v105_v13 }
  0x5b   :  { %866 = vmatmul.mubr.msk.f32.vlgmr.msra.gmra.mrb[6].mxu1 %vm116_vm3, %v112_v15 }
  0xd1   :  { %v733_v23 = vpop.xlane.xlu0 %732 }
  0xd2   :  { %v734_v24 = vadd.f32 %v733_v23, %v729_v22 }
  0xd4   :  { %736 = vst.msk [vmem:[#allocation3] sm:$0x3] %vm87_vm2, %v734_v24 }
  0xdb   :  { %v740_v25 = vld [vmem:[#allocation3] sm:$0x3] }
  0xdc   :  { %v741_v26 = vmax.f32 %v740_v25, 1e-09 }
  0xde   :  { %880 = vrcp.f32 %v741_v26 }
  0xe8   :  { %v881_v27 = vpop.eup %880 }
  0xe9   :  { %746 = vperm.xlu0 %879, %v881_v27  }
 0x120   :  { %v185_v29 = vpop.f32.mrb[0].mxu0 }
 0x121   :  { %v832_v30 = vpop.f32.mrb[1].mxu0  ;;  %v263_v34 = vmul.f32 %v262_v28, %v185_v29 }
 0x122   :  { %v257_v31 = vpop.f32.mrb[0].mxu1 }
 0x123   :  { %v264_v32 = vmul.f32 %v262_v28, %v257_v31  ;;  %v837_v33 = vpop.f32.mrb[1].mxu1 }
 0x124   :  { %v340_v36 = vpop.f32.mrb[2].mxu0 }
 0x125   :  { %v267_v37 = vrot.slane %v264_v32, 7  ;;  %v842_v39 = vpop.f32.mrb[3].mxu0  ;;  %v416_v44 = vmul.f32 %v415_v35, %v340_v36 }
 0x126   :  { %v410_v40 = vpop.f32.mrb[2].mxu1 }
 0x127   :  { %v269_v41 = vsel %vm268_vm4, %v267_v37, %v263_v34  ;;  %v417_v42 = vmul.f32 %v415_v35, %v410_v40  ;;  %v847_v43 = vpop.f32.mrb[3].mxu1 }
 0x128   :  { %v271_v45 = vadd.f32 %v269_v41, %v113_v38  ;;  %v492_v47 = vpop.f32.mrb[4].mxu0 }
 0x129   :  { %v420_v48 = vrot.slane %v417_v42, 7  ;;  %v852_v49 = vpop.f32.mrb[5].mxu0  ;;  %v568_v54 = vmul.f32 %v567_v46, %v492_v47 }
 0x12a   :  { %v562_v50 = vpop.f32.mrb[4].mxu1 }
 0x12b   :  { %v421_v51 = vsel %vm268_vm4, %v420_v48, %v416_v44  ;;  %v569_v52 = vmul.f32 %v567_v46, %v562_v50  ;;  %v857_v53 = vpop.f32.mrb[5].mxu1 }
 0x12c   :  { %v423_v55 = vadd.f32 %v421_v51, %v271_v45  ;;  %v644_v57 = vpop.f32.mrb[6].mxu0 }
 0x12d   :  { %v572_v58 = vrot.slane %v569_v52, 7  ;;  %v862_v59 = vpop.f32.mrb[7].mxu0  ;;  %v720_v63 = vmul.f32 %v719_v56, %v644_v57 }
 0x12e   :  { %v714_v60 = vpop.f32.mrb[6].mxu1 }
 0x12f   :  { %v573_v61 = vsel %vm268_vm4, %v572_v58, %v568_v54  ;;  %v721_v62 = vmul.f32 %v719_v56, %v714_v60  ;;  %v867_v0 = vpop.f32.mrb[7].mxu1 }
 0x130   :  { %v575_v1 = vadd.f32 %v573_v61, %v423_v55 }
 0x131   :  { %v724_v2 = vrot.slane %v721_v62, 7 }
 0x133   :  { %v725_v3 = vsel %vm268_vm4, %v724_v2, %v720_v63 }
 0x134   :  { %v727_v4 = vadd.f32 %v725_v3, %v575_v1 }
 0x136   :  { %728 = vst [vmem:[#allocation2] sm:$0x3] %v727_v4 }
 0x13d   :  { %v743_v6 = vld [vmem:[#allocation2] sm:$0x3] }
 0x168   :  { %v747_v5 = vpop.permute.xlu0 %746 }
 0x169   :  { %v749_v7 = vmul.f32 %v747_v5, %v743_v6 }
 0x16b   :  { %v751_v8 = vsel %vm750_vm5, %v749_v7, 0.0 }
 0x16c   :  { %752 = vadd.xlane.f32.xlu1 %v751_v8 }
 0x1f9   :  { %v753_v9 = vpop.xlane.xlu1 %752 }
 0x1fa   :  { %v755_v10 = vmul.f32 0.0078125, %v753_v9 }
 0x1fc   :  { %v756_v11 = vsub.f32 %v749_v7, %v755_v10 }
 0x1fe   :  { %v757_v12 = vmul.f32 %v756_v11, %v756_v11 }
 0x200   :  { %v758_v13 = vsel %vm750_vm5, %v757_v12, 0.0 }
 0x201   :  { %759 = vadd.xlane.f32.xlu1 %v758_v13 }
 0x28e   :  { %v760_v14 = vpop.xlane.xlu1 %759 }
 0x28f   :  { %v761_v15 = vmul.f32 0.0078125, %v760_v14 }
 0x291   :  { %v762_v16 = vadd.f32 1e-05, %v761_v15 }
 0x293   :  { %882 = vrsqrt.f32 %v762_v16 }
 0x29d   :  { %v883_v17 = vpop.eup %882 }
 0x29e   :  { %v764_v19 = vmul.f32 %v883_v17, %v756_v11 }
 0x2a0   :  { %v772_v21 = vmul.f32 %v810_v18, %v764_v19 }
 0x2a2   :  { %v780_v22 = vadd.f32 %v811_v20, %v772_v21 }
 0x2a4   :  { %781 = vst [vmem:[#allocation12] sm:$0x3] %v780_v22 }
 0x2a5   :  { %971 = shalt.err (!%p968_p3)
}
 0x2a6   :  { %s972_s22 = scalar_lea.hbm %s1160_s8, 32 }
 0x2a7   :  { %p973_p4 = scmp.ne.s32.totalorder %s1160_s8, %s972_s22  ;;  %p976_p5 = scmp.lt.u32.totalorder %s972_s22, %s1160_s8 }
 0x2a9   :  { %p978_p6 = pnand %p976_p5, %p973_p4 }
 0x2ab   :  { %981 = shalt.err (!%p978_p6)
}
 0x2ac   :  { %791 = dma.vmem_to_hbm [thread:$0]  %s789_s19, 32, %s1160_s8, [#allocation6]  }
 0x2ad   :  { %988 = dma.done.wait [#allocation6], 32  }
 0x2ae   :  { %989 = vsyncadd [#allocation6], 4294967264 }
 0x2af   :  { %795 = vsyncpa [#allocation5], 1 }
 0x2b0   :  { %796 = vsyncpa [#allocation10], 1 }
 0x2b1   :  { %797 = vsyncpa [#allocation6], 1 }
 0x2b2   :  { %798 = vsyncpa [#allocation7], 1 }

</bundles_post_ra>
